<compile_context>
chip_gen: v5e
topology: v5e:2x2
jax: 0.10.0
libtpu: 0.0.40
codegen_flags: <defaults>
</compile_context>

<pallas_src>
import functools

import jax
import jax.numpy as jnp
from jax.experimental import pallas as pl
from jax.experimental.pallas import tpu as pltpu


def _round_up(x: int, m: int) -> int:
    return ((x + m - 1) // m) * m


def gap_kernel(bidx_ref, feat_ref, out_ref, acc_ref, cnt_ref, *, eps):
    """Grid: (channel_tiles, point_tiles).

    bidx_ref: (1, TN)   int32   per-point batch index (-1 for padding rows)
    feat_ref: (TN, TC)  float32 feature tile
    out_ref:  (B_pad, TC)       per-batch mean (written once, at the last tile)
    acc_ref:  (B_pad, TC) f32   running per-batch sums  (VMEM scratch)
    cnt_ref:  (B_pad, 1)  f32   running per-batch counts (VMEM scratch)
    """
    t = pl.program_id(1)

    @pl.when(t == 0)
    def _init():
        acc_ref[...] = jnp.zeros_like(acc_ref)
        cnt_ref[...] = jnp.zeros_like(cnt_ref)

    clamped = jnp.maximum(feat_ref[...], eps)            # (TN, TC) clamp(min=eps)

    bidx = bidx_ref[...]                                  # (1, TN) int32
    b_pad = acc_ref.shape[0]
    tn = bidx.shape[1]
    batch_ids = jax.lax.broadcasted_iota(jnp.int32, (b_pad, tn), 0)
    onehot = (batch_ids == bidx).astype(jnp.float32)      # (B_pad, TN); -1 never matches

    # Segment-sum on the MXU: (B_pad, TN) @ (TN, TC) -> (B_pad, TC)
    acc_ref[...] += jnp.dot(onehot, clamped, preferred_element_type=jnp.float32)
    # Per-batch point count for this tile (XLU reduce; channel independent).
    cnt_ref[...] += jnp.sum(onehot, axis=1, keepdims=True)

    @pl.when(t == pl.num_programs(1) - 1)
    def _finalize():
        cnt = jnp.maximum(cnt_ref[...], 1.0)               # empty batch -> 0 row, not NaN
        out_ref[...] = (acc_ref[...] / cnt).astype(out_ref.dtype)


def gap_forward(feats: jax.Array, bidx: jax.Array, num_batches: int,
                eps: float = 1e-6, point_tile: int = 1024,
                channel_tile: int = 128) -> jax.Array:
    """Global average pooling of clamp(feats, eps) grouped by batch index.

    feats: (N, C) float32 sparse-tensor features
    bidx:  (N,)   int32   batch index per point
    returns: (num_batches, C) float32
    """
    N, C = feats.shape
    f32 = jnp.float32

    # Sublane-aligned point tile; shrink toward the input size so small inputs
    # are not padded to a full 1024-row tile.
    tn = max(8, min(point_tile, _round_up(N, 8)))
    n_pad = _round_up(N, tn)
    c_pad = _round_up(C, channel_tile)                     # lane-dense channels
    b_pad = max(8, _round_up(num_batches, 8))              # sublane-pad acc/output

    feats_p = jnp.zeros((n_pad, c_pad), f32).at[:N, :C].set(feats.astype(f32))
    # Sentinel -1 for padded points so they never contribute to any batch.
    bidx_row = jnp.full((1, n_pad), -1, jnp.int32).at[0, :N].set(
        bidx.reshape(-1).astype(jnp.int32))

    n_tiles = n_pad // tn
    n_ctiles = c_pad // channel_tile

    out = pl.pallas_call(
        functools.partial(gap_kernel, eps=eps),
        out_shape=jax.ShapeDtypeStruct((b_pad, c_pad), f32),
        grid_spec=pltpu.PrefetchScalarGridSpec(
            num_scalar_prefetch=0,
            grid=(n_ctiles, n_tiles),
            in_specs=[
                # tiny per-point batch-index row (re-read per channel tile)
                pl.BlockSpec((1, tn), lambda c, t: (0, t)),
                # feature tiles: streamed from HBM once per channel tile
                pl.BlockSpec((tn, channel_tile), lambda c, t: (t, c)),
            ],
            # output block stays resident across the point-tile (reduction) axis
            out_specs=pl.BlockSpec((b_pad, channel_tile), lambda c, t: (0, c)),
            scratch_shapes=[
                pltpu.VMEM((b_pad, channel_tile), f32),     # per-batch sums
                pltpu.VMEM((b_pad, 1), f32),                # per-batch counts
            ],
        ),
        compiler_params=pltpu.CompilerParams(
            dimension_semantics=("parallel", "arbitrary")),
    )(bidx_row, feats_p)

    return out[:num_batches, :C]


if __name__ == "__main__":
    # Small synthetic sparse tensor: B=2 batches, N=64 points total, C=32 channels.
    B, N, C = 2, 64, 32
    eps = 1e-6
    key = jax.random.PRNGKey(0)
    feats = jax.random.normal(key, (N, C), dtype=jnp.float32)
    # First half of the points belong to batch 0, second half to batch 1.
    bidx = (jnp.arange(N, dtype=jnp.int32) >= (N // 2)).astype(jnp.int32)

    out = jax.block_until_ready(gap_forward(feats, bidx, B, eps=eps))

    # Pure-JAX reference: per-batch mean of eps-clamped features.
    clamped = jnp.maximum(feats, eps)
    ref = jnp.stack([
        jnp.sum(jnp.where((bidx == b)[:, None], clamped, 0.0), axis=0)
        / jnp.maximum(jnp.sum(bidx == b), 1).astype(jnp.float32)
        for b in range(B)
    ])

    assert out.shape == (B, C)
    assert jnp.allclose(out, ref, atol=1e-5, rtol=1e-5), "mismatch vs reference"

    print("KERNEL_OK")
</pallas_src>

<mosaic_0001>
module attributes {stable_mosaic.version = 11 : i64} {
  func.func @gap_kernel(%arg0: i32, %arg1: i32, %arg2: memref<1x64xi32, #tpu.memory_space<vmem>>, %arg3: memref<64x128xf32, #tpu.memory_space<vmem>>, %arg4: memref<8x128xf32, #tpu.memory_space<vmem>>, %arg5: memref<8x128xf32, #tpu.memory_space<vmem>>, %arg6: memref<8x1xf32, #tpu.memory_space<vmem>>) attributes {dimension_semantics = [#tpu.dimension_semantics<parallel>, #tpu.dimension_semantics<arbitrary>], iteration_bounds = array<i64: 1, 1>, scalar_prefetch = 0 : i64, scratch_operands = 2 : i64, tpu.core_type = #tpu.core_type<tc>, window_params = [{transform_indices = @transform_0, window_bounds = array<i64: 1, 64>}, {transform_indices = @transform_1, window_bounds = array<i64: 64, 128>}, {transform_indices = @transform_2, window_bounds = array<i64: 8, 128>}]} {
    %c0_i32 = arith.constant 0 : i32
    %0 = arith.cmpi eq, %arg1, %c0_i32 : i32
    %1 = arith.extui %0 : i1 to i32
    %c0_i32_0 = arith.constant 0 : i32
    %2 = arith.cmpi ne, %1, %c0_i32_0 : i32
    scf.if %2 {
      %cst_16 = arith.constant 0.000000e+00 : f32
      %24 = vector.broadcast %cst_16 : f32 to vector<8x128xf32>
      %c0_17 = arith.constant 0 : index
      %c0_18 = arith.constant 0 : index
      %25 = vector.load %arg5[%c0_17, %c0_18] : memref<8x128xf32, #tpu.memory_space<vmem>>, vector<8x128xf32>
      tpu.vector_store %arg5[%c0_17, %c0_18], %24 {strides = array<i32>} : memref<8x128xf32, #tpu.memory_space<vmem>>, vector<8x128xf32>,
      %cst_19 = arith.constant 0.000000e+00 : f32
      %26 = vector.broadcast %cst_19 : f32 to vector<8x1xf32>
      %c0_20 = arith.constant 0 : index
      %c0_21 = arith.constant 0 : index
      %27 = vector.load %arg6[%c0_20, %c0_21] : memref<8x1xf32, #tpu.memory_space<vmem>>, vector<8x1xf32>
      tpu.vector_store %arg6[%c0_20, %c0_21], %26 {strides = array<i32>} : memref<8x1xf32, #tpu.memory_space<vmem>>, vector<8x1xf32>,
    } else {
    }
    %c0 = arith.constant 0 : index
    %c0_1 = arith.constant 0 : index
    %3 = vector.load %arg3[%c0, %c0_1] : memref<64x128xf32, #tpu.memory_space<vmem>>, vector<64x128xf32>
    %cst = arith.constant 9.99999997E-7 : f32
    %4 = vector.broadcast %cst : f32 to vector<64x128xf32>
    %5 = arith.maximumf %3, %4 : vector<64x128xf32>
    %c0_2 = arith.constant 0 : index
    %c0_3 = arith.constant 0 : index
    %6 = vector.load %arg2[%c0_2, %c0_3] : memref<1x64xi32, #tpu.memory_space<vmem>>, vector<1x64xi32>
    %7 = tpu.iota {dimensions = array<i32: 0>} : vector<8x64xi32>
    %8 = vector.broadcast %6 : vector<1x64xi32> to vector<8x64xi32>
    %9 = arith.cmpi eq, %7, %8 : vector<8x64xi32>
    %10 = arith.extui %9 : vector<8x64xi1> to vector<8x64xi32>
    %11 = arith.sitofp %10 : vector<8x64xi32> to vector<8x64xf32>
    %c0_4 = arith.constant 0 : index
    %c0_5 = arith.constant 0 : index
    %12 = vector.load %arg5[%c0_4, %c0_5] : memref<8x128xf32, #tpu.memory_space<vmem>>, vector<8x128xf32>
    %cst_6 = arith.constant dense<0.000000e+00> : vector<8x128xf32>
    %13 = tpu.matmul %11, %5, %cst_6 {dimension_numbers = #tpu.dot_dimension_numbers<[1], [0], [0], [1], [0, 0, 1, 1], [], []>} : vector<8x64xf32>, vector<64x128xf32>, vector<8x128xf32> -> vector<8x128xf32>
    %14 = arith.addf %12, %13 : vector<8x128xf32>
    %c0_7 = arith.constant 0 : index
    %c0_8 = arith.constant 0 : index
    %15 = vector.load %arg5[%c0_7, %c0_8] : memref<8x128xf32, #tpu.memory_space<vmem>>, vector<8x128xf32>
    tpu.vector_store %arg5[%c0_7, %c0_8], %14 {strides = array<i32>} : memref<8x128xf32, #tpu.memory_space<vmem>>, vector<8x128xf32>,
    %c0_9 = arith.constant 0 : index
    %c0_10 = arith.constant 0 : index
    %16 = vector.load %arg6[%c0_9, %c0_10] : memref<8x1xf32, #tpu.memory_space<vmem>>, vector<8x1xf32>
    %cst_11 = arith.constant dense<0.000000e+00> : vector<8xf32>
    %17 = vector.multi_reduction <add>, %11, %cst_11 [1] : vector<8x64xf32> to vector<8xf32>
    %18 = vector.shape_cast %17 : vector<8xf32> to vector<8x1xf32>
    %19 = arith.addf %16, %18 : vector<8x1xf32>
    %c0_12 = arith.constant 0 : index
    %c0_13 = arith.constant 0 : index
    %20 = vector.load %arg6[%c0_12, %c0_13] : memref<8x1xf32, #tpu.memory_space<vmem>>, vector<8x1xf32>
    tpu.vector_store %arg6[%c0_12, %c0_13], %19 {strides = array<i32>} : memref<8x1xf32, #tpu.memory_space<vmem>>, vector<8x1xf32>,
    %c0_i32_14 = arith.constant 0 : i32
    %21 = arith.cmpi eq, %arg1, %c0_i32_14 : i32
    %22 = arith.extui %21 : i1 to i32
    %c0_i32_15 = arith.constant 0 : i32
    %23 = arith.cmpi ne, %22, %c0_i32_15 : i32
    scf.if %23 {
      %c0_16 = arith.constant 0 : index
      %c0_17 = arith.constant 0 : index
      %24 = vector.load %arg6[%c0_16, %c0_17] : memref<8x1xf32, #tpu.memory_space<vmem>>, vector<8x1xf32>
      %cst_18 = arith.constant 1.000000e+00 : f32
      %25 = vector.broadcast %cst_18 : f32 to vector<8x1xf32>
      %26 = arith.maximumf %24, %25 : vector<8x1xf32>
      %c0_19 = arith.constant 0 : index
      %c0_20 = arith.constant 0 : index
      %27 = vector.load %arg5[%c0_19, %c0_20] : memref<8x128xf32, #tpu.memory_space<vmem>>, vector<8x128xf32>
      %28 = vector.broadcast %26 : vector<8x1xf32> to vector<8x128xf32>
      %29 = arith.divf %27, %28 : vector<8x128xf32>
      %c0_21 = arith.constant 0 : index
      %c0_22 = arith.constant 0 : index
      %30 = vector.load %arg4[%c0_21, %c0_22] : memref<8x128xf32, #tpu.memory_space<vmem>>, vector<8x128xf32>
      tpu.vector_store %arg4[%c0_21, %c0_22], %29 {strides = array<i32>} : memref<8x128xf32, #tpu.memory_space<vmem>>, vector<8x128xf32>,
    } else {
    }
    return
  }
  func.func @transform_0(%arg0: i32, %arg1: i32) -> (i32, i32) {
    %c0_i32 = arith.constant 0 : i32
    %c0_i32_0 = arith.constant 0 : i32
    return %c0_i32, %arg1 : i32, i32
  }
  func.func @transform_1(%arg0: i32, %arg1: i32) -> (i32, i32) {
    %c0_i32 = arith.constant 0 : i32
    return %arg1, %arg0 : i32, i32
  }
  func.func @transform_2(%arg0: i32, %arg1: i32) -> (i32, i32) {
    %c0_i32 = arith.constant 0 : i32
    %c0_i32_0 = arith.constant 0 : i32
    return %c0_i32, %arg0 : i32, i32
  }
}

</mosaic_0001>

<bundles_post_ra>
// kernel: tpu_custom_call.1
= control target key start
LH: loop header
LB: loop body
LE: loop exit
PB: predicated region body
PF: predicated region fallthrough
CT: control target
= control target key end

     0   :  { %7 = vsyncpa [#allocation5], 0  ;;  %s277_s0 = inlined_call_operand.hbm [shape: s32[1,64], index: 0, kind: input, shape index: {}]   ;;  %s278_s1 = inlined_call_operand.hbm [shape: f32[64,128], index: 1, kind: input, shape index: {}]   ;;  %s279_s2 = inlined_call_operand.hbm [shape: f32[8,128], index: 2, kind: output, shape index: {}]  }
   0x1   :  { %8 = vsyncpa [#allocation8], 0 }
   0x2   :  { %9 = vsyncpa [#allocation6], 0  ;;  %s15_s11 = sshll.u32 %s277_s0, 4  ;;  %s242_s12 = smov [#allocation4]   ;;  %s16_s11 = int_to_ptr.hbm [resolvable:$true] %s15_s11 }
   0x3   :  { %s17_s13 = sshll.u32 %s242_s12, 4  ;;  %s25_s16 = sshll.u32 %s278_s1, 4  ;;  %s18_s13 = int_to_ptr.vmem [resolvable:$true] %s17_s13  ;;  %s26_s16 = int_to_ptr.hbm [resolvable:$true] %s25_s16 }
   0x4   :  { %20 = dma.hbm_to_vmem [thread:$0]  %s16_s11, 16, %s18_s13, [#allocation5]  }
   0x5   :  { %s243_s17 = smov [#allocation7]   ;;  %s244_s19 = smov 128  }
   0x6   :  { %s27_s18 = sshll.u32 %s243_s17, 4  ;;  %s245_s20 = smov 8   ;;  %s28_s18 = int_to_ptr.vmem [resolvable:$true] %s27_s18 }
   0x7   :  { %33 = dma.hbm_to_vmem [thread:$0]  %s26_s16, 1024, %s28_s18, [#allocation8], %s244_s19, %s244_s19, %s245_s20  }
   0x8   :  { %236 = dma.done.wait [#allocation5], 16  }
   0x9   :  { %237 = vsyncadd [#allocation5], 4294967280 }
   0xa   :  { %238 = dma.done.wait [#allocation8], 1024  }
   0xb   :  { %239 = vsyncadd [#allocation8], 4294966272  ;;  %vm47_vm0 = vcmask 7168   ;;  %v66_v0 = vlaneseq  ;;  %v246_v1 = vmov 0.0   ;;  %v161_v3 = vld [vmem:[#allocation4] ss:$0 sm:$0xff] }
   0xc   :  { %48 = vst.msk [vmem:[#allocation3] sm:$0xff] %vm47_vm0, %v246_v1  ;;  %vm73_vm1 = vcmask 523264   ;;  %v56_v6 = vld [vmem:[#allocation7 + $0x38] sm:$0xff]  ;;  %v55_v8 = vld [vmem:[#allocation7 + $0x30] sm:$0xff]  ;;  %v54_v9 = vld [vmem:[#allocation7 + $0x28] sm:$0xff]  ;;  %v247_v13 = vmov 0  }
   0xd   :  { %v67_v2 = vshrl.u32 %v66_v0, 7  ;;  %v64_v7 = vmax.f32 %v56_v6, 1e-06  ;;  %v53_v10 = vld [vmem:[#allocation7 + $0x20] sm:$0xff]  ;;  %v63_v11 = vmax.f32 %v55_v8, 1e-06  ;;  %160 = vset.pattern.permute.xlu0 %v247_v13 }
   0xe   :  { %v62_v12 = vmax.f32 %v54_v9, 1e-06  ;;  %v52_v14 = vld [vmem:[#allocation7 + $0x18] sm:$0xff]  ;;  %v61_v15 = vmax.f32 %v53_v10, 1e-06  ;;  %v51_v17 = vld [vmem:[#allocation7 + $0x10] sm:$0xff] }
   0xf   :  { %vm69_vm2 = vcmp.eq.s32.totalorder %v67_v2, %v161_v3  ;;  %85 = vmatpush.msra.mxu0 %v64_v7  ;;  %v60_v16 = vmax.f32 %v52_v14, 1e-06  ;;  %v59_v18 = vmax.f32 %v51_v17, 1e-06  ;;  %v50_v19 = vld [vmem:[#allocation7 + $0x8] sm:$0xff]  ;;  %v49_v20 = vld [vmem:[#allocation7] sm:$0xff] }
  0x10   :  { %v151_v4 = vsel %vm69_vm2, 1.0, %v246_v1  ;;  %v58_v21 = vmax.f32 %v50_v19, 1e-06  ;;  %v57_v22 = vmax.f32 %v49_v20, 1e-06  ;;  %s248_s0 = smov [#allocation9]  }
  0x11   :  { %v100_v5 = vsel %vm73_vm1, %v151_v4, 0.0  ;;  %86 = vmatpush.msra.mxu0 %v63_v11  ;;  %s138_s1 = sshll.u32 %s248_s0, 4  ;;  %s140_s23 = sshll.u32 %s279_s2, 4  ;;  %s139_s1 = int_to_ptr.vmem [resolvable:$true] %s138_s1  ;;  %s141_s23 = int_to_ptr.hbm [resolvable:$true] %s140_s23 }
  0x12   :  { %101 = vadd.xlane.f32.xlu0 %v100_v5 }
  0x13   :  { %87 = vmatpush.msra.mxu0 %v62_v12  ;;  %v99_v23 = vld [vmem:[#allocation3] sm:$0xff] }
  0x15   :  { %88 = vmatpush.msra.mxu0 %v61_v15 }
  0x17   :  { %89 = vmatpush.msra.mxu0 %v60_v16 }
  0x19   :  { %90 = vmatpush.msra.mxu0 %v59_v18 }
  0x1b   :  { %91 = vmatpush.msra.mxu0 %v58_v21 }
  0x1d   :  { %92 = vmatpush.msra.mxu0 %v57_v22 }
  0x1e   :  { %152 = vmatmul.msk.f32.vlgmr.msra.gmra.mxu0 %vm73_vm1, %v151_v4 }
  0x85   :  { %v102_v24 = vpop.xlane.xlu0 %101 }
  0x86   :  { %v103_v25 = vadd.f32 %v102_v24, %v99_v23 }
  0x88   :  { %105 = vst.msk [vmem:[#allocation3] sm:$0xff] %vm47_vm0, %v103_v25 }
  0x8f   :  { %v109_v26 = vld [vmem:[#allocation3] sm:$0xff] }
  0x90   :  { %v110_v27 = vmax.f32 %v109_v26, 1.0 }
  0x92   :  { %114 = vperm.xlu0 %160, %v110_v27  }
  0x9b   :  { %v94_v36 = vpop.f32.mrf.mxu0 }
 0x104   :  { %v115_v28 = vpop.permute.xlu0 %114 }
 0x105   :  { %162 = vrcp.f32 %v115_v28  ;;  %v128_v32 = vand.u32 2147483648, %v115_v28  ;;  %v126_v34 = vand.u32 2147483647, %v115_v28  ;;  %vm122_vm4 = vweird.f32 %v115_v28 }
 0x107   :  { %v129_v37 = vor.u32 1.1754944e-38, %v128_v32  ;;  %vm127_vm6 = vcmp.eq.f32.partialorder %v126_v34, 8.507059e+37 }
 0x10b   :  { %v163_v29 = vpop.eup %162 }
 0x10c   :  { %v118_v30 = vmul.f32 %v163_v29, %v115_v28  ;;  %vm123_vm3 = vweird.f32 %v163_v29 }
 0x10d   :  { %vm124_vm5 = vmor %vm122_vm4, %vm123_vm3 }
 0x10e   :  { %v119_v31 = vsub.f32 1.0, %v118_v30 }
 0x110   :  { %v120_v33 = vmul.f32 %v163_v29, %v119_v31 }
 0x112   :  { %v121_v35 = vadd.f32 %v163_v29, %v120_v33 }
 0x114   :  { %v125_v38 = vsel %vm124_vm5, %v163_v29, %v121_v35 }
 0x115   :  { %v130_v39 = vsel %vm127_vm6, %v129_v37, %v125_v38 }
 0x116   :  { %v131_v40 = vmul.f32 %v130_v39, %v94_v36 }
 0x118   :  { %132 = vst [vmem:[#allocation9] sm:$0xff] %v131_v40 }
 0x119   :  { %143 = dma.vmem_to_hbm [thread:$0]  %s139_s1, 128, %s141_s23, [#allocation6]  }
 0x11a   :  { %240 = dma.done.wait [#allocation6], 128  }
 0x11b   :  { %241 = vsyncadd [#allocation6], 4294967168 }
 0x11c   :  { %148 = vsyncpa [#allocation5], 1 }
 0x11d   :  { %149 = vsyncpa [#allocation8], 1 }
 0x11e   :  { %150 = vsyncpa [#allocation6], 1 }

</bundles_post_ra>
